<compile_context>
chip_gen: v7x
topology: tpu7x:2x2x1
jax: 0.10.0
libtpu: 0.0.40
codegen_flags: <defaults>
</compile_context>

<pallas_src>
import functools

import jax
import jax.numpy as jnp
from jax.experimental import pallas as pl
from jax.experimental.pallas import tpu as pltpu


def _sigmoid1(z):
    # sigmoid(z) == 0.5 * tanh(z / 2) + 0.5 -> a single EUP op per vreg.
    return 0.5 * jnp.tanh(0.5 * z) + 0.5


def _score_predictor_kernel(xT_ref, w1_ref, bw_ref, b2_ref, o_ref, acc_ref, *,
                            act_dtype):
    k = pl.program_id(1)

    @pl.when(k == 0)
    def _():
        acc_ref[...] = jnp.zeros_like(acc_ref)

    # Layer 1 on the MXU: (hidden, block_k) @ (block_k, block_batch), bf16 in,
    # f32 accumulation.  Batch is on lanes.
    acc_ref[...] += jnp.dot(w1_ref[...], xT_ref[...],
                            preferred_element_type=jnp.float32)

    @pl.when(k == pl.num_programs(1) - 1)
    def _():
        z = acc_ref[...] + bw_ref[:, 0:1]               # + b1 (f32, lane-broadcast)
        h = _sigmoid1(z.astype(act_dtype))              # single EUP tanh per vreg
        w2 = bw_ref[:, 1:2].astype(act_dtype)
        # Layer 2: VPU multiply + sublane reduce in f32 (avoids an N=1 MXU tile).
        y = jnp.sum((h * w2).astype(jnp.float32), axis=0, keepdims=True)
        y = y + b2_ref[0]                               # b2 scalar from SMEM
        o_ref[...] = _sigmoid1(y).astype(o_ref.dtype)   # lane-dense (1, bb) store


def _tpu_config():
    """Per-generation knobs: scoped VMEM limit, bf16 elementwise, megacore."""
    kind = ""
    try:
        kind = jax.devices()[0].device_kind.lower()
    except Exception:
        pass
    is_v7 = ("v7" in kind) or ("7x" in kind)
    is_v6 = "v6" in kind
    is_v5 = "v5" in kind

    vmem_cap = None
    try:
        vmem_cap = int(pltpu.get_tpu_info().vmem_capacity_bytes)
    except Exception:
        vmem_cap = None
    if vmem_cap is None:
        # Unknown generation -> assume the small (v7x-like) 64 MiB VMEM.
        vmem_cap = (64 << 20) if (is_v7 or not (is_v5 or is_v6)) else (128 << 20)

    # 128 MiB parts (v5e/v6e): generous 96 MiB scoped limit (bigger tiles, fewer
    # grid-step overheads).  64 MiB parts (v7x): cap at 44 MiB for headroom.
    vmem_limit = (96 << 20) if vmem_cap >= (128 << 20) else (44 << 20)
    act_bf16 = is_v6 or is_v7          # v5e has no bf16 VPU/EUP -> keep f32 there
    two_cores = is_v7                  # 2 TensorCores/chip on v7x
    return vmem_limit, act_bf16, two_cores


def _pick_block_k(feature_dim, hidden, itemsize, vmem_limit):
    """K-tile only when (double-buffered) W1 would eat too much VMEM."""
    w1_bytes = 2 * hidden * feature_dim * itemsize
    if feature_dim % 128 != 0 or w1_bytes <= int(0.35 * vmem_limit):
        return feature_dim
    target = int(0.30 * vmem_limit) // max(2 * hidden * itemsize, 1)
    bk = (target // 128) * 128
    bk = min(max(bk, 256 if feature_dim % 256 == 0 else 128), feature_dim)
    while bk > 128 and feature_dim % bk != 0:
        bk -= 128
    return bk if feature_dim % bk == 0 else feature_dim


def _pick_block_batch(batch, block_k, hidden, itemsize, vmem_limit, two_cores):
    """Budget-aware, lane-aligned batch tile; prefers even grid count on 2-TC parts."""
    if batch % 128 != 0 or batch <= 256:
        return batch
    fixed = 2 * hidden * block_k * itemsize      # W1 tile (worst case: 2 buffers)
    fixed += 2 * hidden * 128 * 4                # packed (b1, w2) after lane padding
    budget = int(0.55 * vmem_limit) - fixed
    per_col = 2 * block_k * itemsize + 3 * hidden * 4 + 16
    max_bb = max(budget // per_col, 128) if budget > 0 else 128
    min_steps = 4 if two_cores else 2
    cap = min(max_bb, max(batch // min_steps, 128), batch)
    cap = max((cap // 128) * 128, 128)
    best = None
    bb = cap
    while bb >= 128:
        if batch % bb == 0:
            if best is None:
                best = bb
            if (not two_cores) or (batch // bb) % 2 == 0:
                return bb
        bb -= 128
    return best if best is not None else batch


def score_predictor(x, w1, b1, w2, b2, *, block_batch=None, block_k=None):
    """x: (batch, feature_dim); w1: (hidden, feature_dim); b1: (hidden,);
    w2: (1, hidden); b2: (1,).  Returns (batch, 1)."""
    batch, feature_dim = x.shape
    hidden, fd2 = w1.shape
    assert fd2 == feature_dim
    assert w2.shape == (1, hidden) and b1.shape == (hidden,) and b2.shape == (1,)

    vmem_limit, act_bf16, two_cores = _tpu_config()
    act_dtype = jnp.bfloat16 if act_bf16 else jnp.float32

    # MXU inputs in bf16 (accumulation stays f32 in-kernel).
    mxu_dtype = jnp.bfloat16
    x_t = x.T.astype(mxu_dtype)                          # (feature_dim, batch)
    w1_m = w1.astype(mxu_dtype)
    # Pack b1 and w2 into a single (hidden, 2) f32 block.
    bw = jnp.concatenate([b1.reshape(hidden, 1), w2.reshape(hidden, 1)],
                         axis=1).astype(jnp.float32)
    b2_s = b2.reshape(1).astype(jnp.float32)

    itemsize = jnp.dtype(mxu_dtype).itemsize
    if block_k is None:
        block_k = _pick_block_k(feature_dim, hidden, itemsize, vmem_limit)
    assert feature_dim % block_k == 0
    if block_batch is None:
        block_batch = _pick_block_batch(batch, block_k, hidden, itemsize,
                                        vmem_limit, two_cores)
    assert batch % block_batch == 0
    assert block_batch == batch or block_batch % 128 == 0

    grid = (batch // block_batch, feature_dim // block_k)
    w1_invariant = grid[1] == 1

    kernel = functools.partial(_score_predictor_kernel, act_dtype=act_dtype)

    cost = pl.CostEstimate(
        flops=2 * batch * feature_dim * hidden + 2 * batch * hidden,
        transcendentals=batch * (hidden + 1),
        bytes_accessed=int(itemsize * (batch * feature_dim + hidden * feature_dim)
                           + 4 * (2 * hidden + 1 + batch)),
    )

    def build(single_buffer_weights):
        w1_kwargs = {}
        bw_kwargs = {}
        if single_buffer_weights:
            # Grid-invariant blocks never change -> one VMEM buffer is enough.
            bw_kwargs = dict(pipeline_mode=pl.Buffered(1))
            if w1_invariant:
                w1_kwargs = dict(pipeline_mode=pl.Buffered(1))
        return pl.pallas_call(
            kernel,
            out_shape=jax.ShapeDtypeStruct((1, batch), x.dtype),
            grid_spec=pltpu.PrefetchScalarGridSpec(
                num_scalar_prefetch=0,
                grid=grid,
                in_specs=[
                    pl.BlockSpec((block_k, block_batch), lambda i, k: (k, i)),
                    pl.BlockSpec((hidden, block_k), lambda i, k: (0, k),
                                 **w1_kwargs),
                    pl.BlockSpec((hidden, 2), lambda i, k: (0, 0), **bw_kwargs),
                    pl.BlockSpec(memory_space=pltpu.MemorySpace.SMEM),   # b2
                ],
                out_specs=pl.BlockSpec((1, block_batch), lambda i, k: (0, i)),
                scratch_shapes=[pltpu.VMEM((hidden, block_batch), jnp.float32)],
            ),
            compiler_params=pltpu.CompilerParams(
                dimension_semantics=("parallel", "arbitrary"),
                vmem_limit_bytes=vmem_limit,
            ),
            cost_estimate=cost,
        )

    try:
        out_row = build(True)(x_t, w1_m, bw, b2_s)
    except Exception:
        # pl.Buffered(1) not supported on this jax build -> default buffering.
        out_row = build(False)(x_t, w1_m, bw, b2_s)

    # TODO(synk): consider pl.Buffered(3) on the x^T spec for v5e if xprof shows
    # exposed DMA waits on the ~0.82 TB/s HBM parts.
    return out_row.reshape(batch, 1)


def init_params(key, feature_dim, dtype=jnp.float32):
    """nn.Linear-style U(-1/sqrt(fan_in), 1/sqrt(fan_in)) init, PyTorch layouts."""
    hidden = feature_dim * 4
    k1, k2, k3, k4 = jax.random.split(key, 4)
    bound1 = 1.0 / (feature_dim ** 0.5)
    bound2 = 1.0 / (hidden ** 0.5)
    w1 = jax.random.uniform(k1, (hidden, feature_dim), dtype, -bound1, bound1)
    b1 = jax.random.uniform(k2, (hidden,), dtype, -bound1, bound1)
    w2 = jax.random.uniform(k3, (1, hidden), dtype, -bound2, bound2)
    b2 = jax.random.uniform(k4, (1,), dtype, -bound2, bound2)
    return w1, b1, w2, b2


def reference(x, w1, b1, w2, b2):
    h = jax.nn.sigmoid(x @ w1.T + b1)
    return jax.nn.sigmoid(h @ w2.T + b2)


if __name__ == "__main__":
    key = jax.random.PRNGKey(0)
    kx, kp, kx2, kp2 = jax.random.split(key, 4)

    # Small-shape smoke test (single grid step; full-dim blocks).
    batch, feature_dim = 8, 32            # hidden = feature_dim * 4 = 128
    x = jax.random.normal(kx, (batch, feature_dim), jnp.float32)
    w1, b1, w2, b2 = init_params(kp, feature_dim)
    out = jax.block_until_ready(score_predictor(x, w1, b1, w2, b2))
    ref = reference(x, w1, b1, w2, b2)
    assert out.shape == (batch, 1), out.shape
    assert jnp.allclose(out, ref, atol=1e-2, rtol=1e-2), (out, ref)

    # Exercise the tiled path (batch grid axis + K grid axis with accumulator).
    batch2, feature_dim2 = 512, 256       # hidden = 1024
    x2 = jax.random.normal(kx2, (batch2, feature_dim2), jnp.float32)
    w1b, b1b, w2b, b2b = init_params(kp2, feature_dim2)
    out2 = jax.block_until_ready(
        score_predictor(x2, w1b, b1b, w2b, b2b, block_batch=256, block_k=128))
    ref2 = reference(x2, w1b, b1b, w2b, b2b)
    assert out2.shape == (batch2, 1), out2.shape
    assert jnp.allclose(out2, ref2, atol=1e-2, rtol=1e-2)

    print("KERNEL_OK")
</pallas_src>

<mosaic_0001>
module attributes {stable_mosaic.version = 11 : i64} {
  func.func @_score_predictor_kernel(%arg0: i32, %arg1: i32, %arg2: memref<32x8xbf16, #tpu.memory_space<vmem>>, %arg3: memref<128x32xbf16, #tpu.memory_space<vmem>>, %arg4: memref<128x2xf32, #tpu.memory_space<vmem>>, %arg5: memref<1xf32, #tpu.memory_space<smem>>, %arg6: memref<1x8xf32, #tpu.memory_space<vmem>>, %arg7: memref<128x8xf32, #tpu.memory_space<vmem>>) attributes {dimension_semantics = [#tpu.dimension_semantics<parallel>, #tpu.dimension_semantics<arbitrary>], iteration_bounds = array<i64: 1, 1>, scalar_prefetch = 0 : i64, scratch_operands = 1 : i64, tpu.core_type = #tpu.core_type<tc>, window_params = [{transform_indices = @transform_0, window_bounds = array<i64: 32, 8>}, {pipeline_mode = #tpu.pipeline_mode<synchronous>, transform_indices = @transform_1, window_bounds = array<i64: 128, 32>}, {pipeline_mode = #tpu.pipeline_mode<synchronous>, transform_indices = @transform_2, window_bounds = array<i64: 128, 2>}, {transform_indices = @transform_3, window_bounds = array<i64: 1>}, {transform_indices = @transform_4, window_bounds = array<i64: 1, 8>}]} {
    %c0_i32 = arith.constant 0 : i32
    %0 = arith.cmpi eq, %arg1, %c0_i32 : i32
    %1 = arith.extui %0 : i1 to i32
    %c0_i32_0 = arith.constant 0 : i32
    %2 = arith.cmpi ne, %1, %c0_i32_0 : i32
    scf.if %2 {
      %cst_10 = arith.constant 0.000000e+00 : f32
      %12 = vector.broadcast %cst_10 : f32 to vector<128x8xf32>
      %c0_11 = arith.constant 0 : index
      %c0_12 = arith.constant 0 : index
      %13 = vector.load %arg7[%c0_11, %c0_12] : memref<128x8xf32, #tpu.memory_space<vmem>>, vector<128x8xf32>
      tpu.vector_store %arg7[%c0_11, %c0_12], %12 {strides = array<i32>} : memref<128x8xf32, #tpu.memory_space<vmem>>, vector<128x8xf32>,
    } else {
    }
    %c0 = arith.constant 0 : index
    %c0_1 = arith.constant 0 : index
    %3 = vector.load %arg7[%c0, %c0_1] : memref<128x8xf32, #tpu.memory_space<vmem>>, vector<128x8xf32>
    %c0_2 = arith.constant 0 : index
    %c0_3 = arith.constant 0 : index
    %4 = vector.load %arg3[%c0_2, %c0_3] : memref<128x32xbf16, #tpu.memory_space<vmem>>, vector<128x32xbf16>
    %c0_4 = arith.constant 0 : index
    %c0_5 = arith.constant 0 : index
    %5 = vector.load %arg2[%c0_4, %c0_5] : memref<32x8xbf16, #tpu.memory_space<vmem>>, vector<32x8xbf16>
    %cst = arith.constant dense<0.000000e+00> : vector<128x8xf32>
    %6 = tpu.matmul %4, %5, %cst {dimension_numbers = #tpu.dot_dimension_numbers<[1], [0], [0], [1], [0, 0, 1, 1], [], []>} : vector<128x32xbf16>, vector<32x8xbf16>, vector<128x8xf32> -> vector<128x8xf32>
    %7 = arith.addf %3, %6 : vector<128x8xf32>
    %c0_6 = arith.constant 0 : index
    %c0_7 = arith.constant 0 : index
    %8 = vector.load %arg7[%c0_6, %c0_7] : memref<128x8xf32, #tpu.memory_space<vmem>>, vector<128x8xf32>
    tpu.vector_store %arg7[%c0_6, %c0_7], %7 {strides = array<i32>} : memref<128x8xf32, #tpu.memory_space<vmem>>, vector<128x8xf32>,
    %c0_i32_8 = arith.constant 0 : i32
    %9 = arith.cmpi eq, %arg1, %c0_i32_8 : i32
    %10 = arith.extui %9 : i1 to i32
    %c0_i32_9 = arith.constant 0 : i32
    %11 = arith.cmpi ne, %10, %c0_i32_9 : i32
    scf.if %11 {
      %c0_10 = arith.constant 0 : index
      %c0_11 = arith.constant 0 : index
      %12 = vector.load %arg7[%c0_10, %c0_11] : memref<128x8xf32, #tpu.memory_space<vmem>>, vector<128x8xf32>
      %c0_12 = arith.constant 0 : index
      %c0_13 = arith.constant 0 : index
      %13 = vector.load %arg4[%c0_12, %c0_13] : memref<128x2xf32, #tpu.memory_space<vmem>>, vector<128x1xf32>
      %14 = vector.broadcast %13 : vector<128x1xf32> to vector<128x8xf32>
      %15 = arith.addf %12, %14 : vector<128x8xf32>
      %cst_14 = arith.constant 5.000000e-01 : f32
      %16 = vector.broadcast %cst_14 : f32 to vector<128x8xf32>
      %17 = arith.mulf %16, %15 : vector<128x8xf32>
      %18 = math.tanh %17 : vector<128x8xf32>
      %cst_15 = arith.constant 5.000000e-01 : f32
      %19 = vector.broadcast %cst_15 : f32 to vector<128x8xf32>
      %20 = arith.mulf %19, %18 : vector<128x8xf32>
      %cst_16 = arith.constant 5.000000e-01 : f32
      %21 = vector.broadcast %cst_16 : f32 to vector<128x8xf32>
      %22 = arith.addf %20, %21 : vector<128x8xf32>
      %c0_17 = arith.constant 0 : index
      %c1 = arith.constant 1 : index
      %23 = vector.load %arg4[%c0_17, %c1] : memref<128x2xf32, #tpu.memory_space<vmem>>, vector<128x1xf32>
      %24 = vector.broadcast %23 : vector<128x1xf32> to vector<128x8xf32>
      %25 = arith.mulf %22, %24 : vector<128x8xf32>
      %cst_18 = arith.constant dense<0.000000e+00> : vector<8xf32>
      %26 = vector.multi_reduction <add>, %25, %cst_18 [0] : vector<128x8xf32> to vector<8xf32>
      %27 = vector.shape_cast %26 : vector<8xf32> to vector<1x8xf32>
      %c0_19 = arith.constant 0 : index
      %28 = memref.load %arg5[%c0_19] : memref<1xf32, #tpu.memory_space<smem>>
      %29 = vector.broadcast %28 : f32 to vector<1x8xf32>
      %30 = arith.addf %27, %29 : vector<1x8xf32>
      %cst_20 = arith.constant 5.000000e-01 : f32
      %31 = vector.broadcast %cst_20 : f32 to vector<1x8xf32>
      %32 = arith.mulf %31, %30 : vector<1x8xf32>
      %33 = math.tanh %32 : vector<1x8xf32>
      %cst_21 = arith.constant 5.000000e-01 : f32
      %34 = vector.broadcast %cst_21 : f32 to vector<1x8xf32>
      %35 = arith.mulf %34, %33 : vector<1x8xf32>
      %cst_22 = arith.constant 5.000000e-01 : f32
      %36 = vector.broadcast %cst_22 : f32 to vector<1x8xf32>
      %37 = arith.addf %35, %36 : vector<1x8xf32>
      %c0_23 = arith.constant 0 : index
      %c0_24 = arith.constant 0 : index
      %38 = vector.load %arg6[%c0_23, %c0_24] : memref<1x8xf32, #tpu.memory_space<vmem>>, vector<1x8xf32>
      tpu.vector_store %arg6[%c0_23, %c0_24], %37 {strides = array<i32>} : memref<1x8xf32, #tpu.memory_space<vmem>>, vector<1x8xf32>,
    } else {
    }
    return
  }
  func.func @transform_0(%arg0: i32, %arg1: i32) -> (i32, i32) {
    %c0_i32 = arith.constant 0 : i32
    return %arg1, %arg0 : i32, i32
  }
  func.func @transform_1(%arg0: i32, %arg1: i32) -> (i32, i32) {
    %c0_i32 = arith.constant 0 : i32
    %c0_i32_0 = arith.constant 0 : i32
    return %c0_i32, %arg1 : i32, i32
  }
  func.func @transform_2(%arg0: i32, %arg1: i32) -> (i32, i32) {
    %c0_i32 = arith.constant 0 : i32
    %c0_i32_0 = arith.constant 0 : i32
    %c0_i32_1 = arith.constant 0 : i32
    return %c0_i32, %c0_i32_0 : i32, i32
  }
  func.func @transform_3(%arg0: i32, %arg1: i32) -> i32 {
    %c0_i32 = arith.constant 0 : i32
    %c0_i32_0 = arith.constant 0 : i32
    return %c0_i32 : i32
  }
  func.func @transform_4(%arg0: i32, %arg1: i32) -> (i32, i32) {
    %c0_i32 = arith.constant 0 : i32
    %c0_i32_0 = arith.constant 0 : i32
    return %c0_i32, %arg0 : i32, i32
  }
}

module attributes {stable_mosaic.version = 11 : i64} {
  func.func @_score_predictor_kernel(%arg0: i32, %arg1: i32, %arg2: memref<32x8xbf16, #tpu.memory_space<vmem>>, %arg3: memref<128x32xbf16, #tpu.memory_space<vmem>>, %arg4: memref<128x2xf32, #tpu.memory_space<vmem>>, %arg5: memref<1xf32, #tpu.memory_space<smem>>, %arg6: memref<1x8xf32, #tpu.memory_space<vmem>>, %arg7: memref<128x8xf32, #tpu.memory_space<vmem>>) attributes {dimension_semantics = [#tpu.dimension_semantics<parallel>, #tpu.dimension_semantics<arbitrary>], iteration_bounds = array<i64: 1, 1>, scalar_prefetch = 0 : i64, scratch_operands = 1 : i64, tpu.core_type = #tpu.core_type<tc>, window_params = [{transform_indices = @transform_0, window_bounds = array<i64: 32, 8>}, {transform_indices = @transform_1, window_bounds = array<i64: 128, 32>}, {pipeline_mode = #tpu.pipeline_mode<synchronous>, transform_indices = @transform_2, window_bounds = array<i64: 128, 2>}, {transform_indices = @transform_3, window_bounds = array<i64: 1>}, {transform_indices = @transform_4, window_bounds = array<i64: 1, 8>}]} {
    %c0_i32 = arith.constant 0 : i32
    %0 = arith.cmpi eq, %arg1, %c0_i32 : i32
    %1 = arith.extui %0 : i1 to i32
    %c0_i32_0 = arith.constant 0 : i32
    %2 = arith.cmpi ne, %1, %c0_i32_0 : i32
    scf.if %2 {
      %cst_10 = arith.constant 0.000000e+00 : f32
      %12 = vector.broadcast %cst_10 : f32 to vector<128x8xf32>
      %c0_11 = arith.constant 0 : index
      %c0_12 = arith.constant 0 : index
      %13 = vector.load %arg7[%c0_11, %c0_12] : memref<128x8xf32, #tpu.memory_space<vmem>>, vector<128x8xf32>
      tpu.vector_store %arg7[%c0_11, %c0_12], %12 {strides = array<i32>} : memref<128x8xf32, #tpu.memory_space<vmem>>, vector<128x8xf32>,
    } else {
    }
    %c0 = arith.constant 0 : index
    %c0_1 = arith.constant 0 : index
    %3 = vector.load %arg7[%c0, %c0_1] : memref<128x8xf32, #tpu.memory_space<vmem>>, vector<128x8xf32>
    %c0_2 = arith.constant 0 : index
    %c0_3 = arith.constant 0 : index
    %4 = vector.load %arg3[%c0_2, %c0_3] : memref<128x32xbf16, #tpu.memory_space<vmem>>, vector<128x32xbf16>
    %c0_4 = arith.constant 0 : index
    %c0_5 = arith.constant 0 : index
    %5 = vector.load %arg2[%c0_4, %c0_5] : memref<32x8xbf16, #tpu.memory_space<vmem>>, vector<32x8xbf16>
    %cst = arith.constant dense<0.000000e+00> : vector<128x8xf32>
    %6 = tpu.matmul %4, %5, %cst {dimension_numbers = #tpu.dot_dimension_numbers<[1], [0], [0], [1], [0, 0, 1, 1], [], []>} : vector<128x32xbf16>, vector<32x8xbf16>, vector<128x8xf32> -> vector<128x8xf32>
    %7 = arith.addf %3, %6 : vector<128x8xf32>
    %c0_6 = arith.constant 0 : index
    %c0_7 = arith.constant 0 : index
    %8 = vector.load %arg7[%c0_6, %c0_7] : memref<128x8xf32, #tpu.memory_space<vmem>>, vector<128x8xf32>
    tpu.vector_store %arg7[%c0_6, %c0_7], %7 {strides = array<i32>} : memref<128x8xf32, #tpu.memory_space<vmem>>, vector<128x8xf32>,
    %c0_i32_8 = arith.constant 0 : i32
    %9 = arith.cmpi eq, %arg1, %c0_i32_8 : i32
    %10 = arith.extui %9 : i1 to i32
    %c0_i32_9 = arith.constant 0 : i32
    %11 = arith.cmpi ne, %10, %c0_i32_9 : i32
    scf.if %11 {
      %c0_10 = arith.constant 0 : index
      %c0_11 = arith.constant 0 : index
      %12 = vector.load %arg7[%c0_10, %c0_11] : memref<128x8xf32, #tpu.memory_space<vmem>>, vector<128x8xf32>
      %c0_12 = arith.constant 0 : index
      %c0_13 = arith.constant 0 : index
      %13 = vector.load %arg4[%c0_12, %c0_13] : memref<128x2xf32, #tpu.memory_space<vmem>>, vector<128x1xf32>
      %14 = vector.broadcast %13 : vector<128x1xf32> to vector<128x8xf32>
      %15 = arith.addf %12, %14 : vector<128x8xf32>
      %cst_14 = arith.constant 5.000000e-01 : f32
      %16 = vector.broadcast %cst_14 : f32 to vector<128x8xf32>
      %17 = arith.mulf %16, %15 : vector<128x8xf32>
      %18 = math.tanh %17 : vector<128x8xf32>
      %cst_15 = arith.constant 5.000000e-01 : f32
      %19 = vector.broadcast %cst_15 : f32 to vector<128x8xf32>
      %20 = arith.mulf %19, %18 : vector<128x8xf32>
      %cst_16 = arith.constant 5.000000e-01 : f32
      %21 = vector.broadcast %cst_16 : f32 to vector<128x8xf32>
      %22 = arith.addf %20, %21 : vector<128x8xf32>
      %c0_17 = arith.constant 0 : index
      %c1 = arith.constant 1 : index
      %23 = vector.load %arg4[%c0_17, %c1] : memref<128x2xf32, #tpu.memory_space<vmem>>, vector<128x1xf32>
      %24 = vector.broadcast %23 : vector<128x1xf32> to vector<128x8xf32>
      %25 = arith.mulf %22, %24 : vector<128x8xf32>
      %cst_18 = arith.constant dense<0.000000e+00> : vector<8xf32>
      %26 = vector.multi_reduction <add>, %25, %cst_18 [0] : vector<128x8xf32> to vector<8xf32>
      %27 = vector.shape_cast %26 : vector<8xf32> to vector<1x8xf32>
      %c0_19 = arith.constant 0 : index
      %28 = memref.load %arg5[%c0_19] : memref<1xf32, #tpu.memory_space<smem>>
      %29 = vector.broadcast %28 : f32 to vector<1x8xf32>
      %30 = arith.addf %27, %29 : vector<1x8xf32>
      %cst_20 = arith.constant 5.000000e-01 : f32
      %31 = vector.broadcast %cst_20 : f32 to vector<1x8xf32>
      %32 = arith.mulf %31, %30 : vector<1x8xf32>
      %33 = math.tanh %32 : vector<1x8xf32>
      %cst_21 = arith.constant 5.000000e-01 : f32
      %34 = vector.broadcast %cst_21 : f32 to vector<1x8xf32>
      %35 = arith.mulf %34, %33 : vector<1x8xf32>
      %cst_22 = arith.constant 5.000000e-01 : f32
      %36 = vector.broadcast %cst_22 : f32 to vector<1x8xf32>
      %37 = arith.addf %35, %36 : vector<1x8xf32>
      %c0_23 = arith.constant 0 : index
      %c0_24 = arith.constant 0 : index
      %38 = vector.load %arg6[%c0_23, %c0_24] : memref<1x8xf32, #tpu.memory_space<vmem>>, vector<1x8xf32>
      tpu.vector_store %arg6[%c0_23, %c0_24], %37 {strides = array<i32>} : memref<1x8xf32, #tpu.memory_space<vmem>>, vector<1x8xf32>,
    } else {
    }
    return
  }
  func.func @transform_0(%arg0: i32, %arg1: i32) -> (i32, i32) {
    %c0_i32 = arith.constant 0 : i32
    return %arg1, %arg0 : i32, i32
  }
  func.func @transform_1(%arg0: i32, %arg1: i32) -> (i32, i32) {
    %c0_i32 = arith.constant 0 : i32
    %c0_i32_0 = arith.constant 0 : i32
    return %c0_i32, %arg1 : i32, i32
  }
  func.func @transform_2(%arg0: i32, %arg1: i32) -> (i32, i32) {
    %c0_i32 = arith.constant 0 : i32
    %c0_i32_0 = arith.constant 0 : i32
    %c0_i32_1 = arith.constant 0 : i32
    return %c0_i32, %c0_i32_0 : i32, i32
  }
  func.func @transform_3(%arg0: i32, %arg1: i32) -> i32 {
    %c0_i32 = arith.constant 0 : i32
    %c0_i32_0 = arith.constant 0 : i32
    return %c0_i32 : i32
  }
  func.func @transform_4(%arg0: i32, %arg1: i32) -> (i32, i32) {
    %c0_i32 = arith.constant 0 : i32
    %c0_i32_0 = arith.constant 0 : i32
    return %c0_i32, %arg0 : i32, i32
  }
}

</mosaic_0001>

<bundles_post_ra>
// kernel: tpu_custom_call.1
= control target key start
LH: loop header
LB: loop body
LE: loop exit
PB: predicated region body
PF: predicated region fallthrough
CT: control target
= control target key end

     0   :  { %vm129_vm0 = vcmask 261120   ;;  %v753_v7 = vmov 0   ;;  %s990_s0 = inlined_call_operand.vmem [shape: bf16[32,8], index: 0, kind: input, shape index: {}]   ;;  %s991_s1 = inlined_call_operand.vmem [shape: bf16[128,32], index: 1, kind: input, shape index: {}]   ;;  %s992_s2 = inlined_call_operand.vmem [shape: f32[128,2], index: 2, kind: input, shape index: {}]   ;;  %s993_s3 = inlined_call_operand.<no memory space> [shape: f32[1], index: 3, kind: input, shape index: {}]   ;;  %s994_s4 = inlined_call_operand.hbm [shape: f32[1,8], index: 4, kind: output, shape index: {}]  }
   0x1   :  { %v685_v0 = vld [vmem:[%s990_s0] sm:$0xff]   ;;  %v686_v1 = vld [vmem:[%s990_s0 + $0x8] sm:$0xff]   ;;  %v691_v6 = vld [vmem:[%s991_s1 + $0x10] sm:$0xff]   ;;  %676 = vset.pattern.permute.xlu1 %v753_v7  ;;  %675 = vset.pattern.permute.xlu0 %v753_v7 }
   0x2   :  { %647 = vmatprep.subr.bf16.mxu0 %v685_v0  ;;  %667 = vmatprep.subr.bf16.mxu1 %v685_v0  ;;  %v687_v2 = vld [vmem:[%s991_s1] sm:$0xff]   ;;  %v689_v4 = vld [vmem:[%s991_s1 + $0x8] sm:$0xff]   ;;  %v692_v8 = vld [vmem:[%s991_s1 + $0x30] sm:$0xff]  }
   0x3   :  { %648 = vmatpush3.bf16.msra.mxu0 %v685_v0  ;;  %669 = vmatpush3.bf16.msra.mxu1 %v685_v0  ;;  %v688_v3 = vld [vmem:[%s991_s1 + $0x20] sm:$0xff]   ;;  %v690_v5 = vld [vmem:[%s991_s1 + $0x28] sm:$0xff]   ;;  %v305_v9 = vld [vmem:[%s992_s2 + $0x10] sm:$0xff] }
   0x4   :  { %649 = vmatprep.subr.bf16.mxu0 %v686_v1  ;;  %668 = vmatprep.subr.bf16.mxu1 %v686_v1  ;;  %v303_v10 = vld [vmem:[%s992_s2] sm:$0xff]  ;;  %v306_v11 = vld [vmem:[%s992_s2 + $0x18] sm:$0xff]  ;;  %v304_v12 = vld [vmem:[%s992_s2 + $0x8] sm:$0xff] }
   0x5   :  { %651 = vmatprep.mubr.msk.bf16.mxu0 %vm129_vm0, %v687_v2  ;;  %659 = vmatprep.mubr.msk.bf16.mxu1 %vm129_vm0, %v688_v3  ;;  %v693_v13 = vld [vmem:[%s991_s1 + $0x18] sm:$0xff]  }
   0x6   :  { %331 = vperm.xlu1 %676, %v305_v9   ;;  %321 = vperm.xlu0 %675, %v303_v10   ;;  %v694_v14 = vld [vmem:[%s991_s1 + $0x38] sm:$0xff]  }
   0x7   :  { %650 = vmatpush3.bf16.msra.mxu0 %v686_v1  ;;  %670 = vmatpush3.bf16.msra.mxu1 %v686_v1 }
   0xa   :  { %652 = vmatmul.mubr.msk.bf16.vlgmr.msra.gmra.mrb[0].mxu0 %vm129_vm0, %v689_v4  ;;  %660 = vmatmul.mubr.msk.bf16.vlgmr.msra.gmra.mrb[0].mxu1 %vm129_vm0, %v690_v5 }
   0xb   :  { %655 = vmatprep.mubr.msk.bf16.mxu0 %vm129_vm0, %v691_v6  ;;  %663 = vmatprep.mubr.msk.bf16.mxu1 %vm129_vm0, %v692_v8 }
   0xc   :  { %10 = vsyncpa [#allocation5], 0  ;;  %336 = vperm.xlu1 %676, %v306_v11   ;;  %326 = vperm.xlu0 %675, %v304_v12   ;;  %v308_v15 = vld [vmem:[%s992_s2 + $0x28] sm:$0xff]  ;;  %v754_v16 = vmov 1   ;;  %v310_v17 = vld [vmem:[%s992_s2 + $0x38] sm:$0xff]  ;;  %vm24_vm1 = vcmask 64512  }
   0xd   :  { %v307_v18 = vld [vmem:[%s992_s2 + $0x20] sm:$0xff]  ;;  %v312_v19 = vld [vmem:[%s992_s2 + $0x48] sm:$0xff]  ;;  %v309_v20 = vld [vmem:[%s992_s2 + $0x30] sm:$0xff]  ;;  %v755_v26 = vmov 0.0   ;;  %s756_s13 = smov [#allocation4]   ;;  %vm603_vm2 = vcmask 57344  }
   0xe   :  { %v314_v21 = vld [vmem:[%s992_s2 + $0x58] sm:$0xff]  ;;  %v311_v22 = vld [vmem:[%s992_s2 + $0x40] sm:$0xff]  ;;  %v313_v23 = vld [vmem:[%s992_s2 + $0x50] sm:$0xff]  ;;  %27 = vst.msk [vmem:[#allocation2 + $0x10] sm:$0xff] %vm24_vm1, %v755_v26  ;;  %s611_s14 = sshll.u32 %s756_s13, 4  ;;  %s612_s14 = int_to_ptr.vmem [resolvable:$true] %s611_s14 }
   0xf   :  { %v315_v24 = vld [vmem:[%s992_s2 + $0x60] sm:$0xff]  ;;  %v318_v25 = vld [vmem:[%s992_s2 + $0x78] sm:$0xff]  ;;  %25 = vst.msk [vmem:[#allocation2] sm:$0xff] %vm24_vm1, %v755_v26  ;;  %26 = vst.msk [vmem:[#allocation2 + $0x8] sm:$0xff] %vm24_vm1, %v755_v26  ;;  %s729_s15 = scalar_lea.vmem %s612_s14, 16  ;;  %s733_s16 = scalar_lea.vmem %s612_s14, 32 }
  0x10   :  { %346 = vperm.xlu1 %676, %v308_v15   ;;  %678 = vset.pattern.permute.xlu0 %v754_v16  ;;  %28 = vst.msk [vmem:[#allocation2 + $0x18] sm:$0xff] %vm24_vm1, %v755_v26  ;;  %29 = vst.msk [vmem:[#allocation2 + $0x20] sm:$0xff] %vm24_vm1, %v755_v26  ;;  %v316_v27 = vld [vmem:[%s992_s2 + $0x68] sm:$0xff]  ;;  %v317_v28 = vld [vmem:[%s992_s2 + $0x70] sm:$0xff]  ;;  %p730_p0 = scmp.ne.s32.totalorder %s612_s14, %s729_s15  ;;  %p734_p1 = scmp.lt.s32.totalorder %s612_s14, %s612_s14 }
  0x11   :  { %484 = vperm.xlu0 %678, %v304_v12   ;;  %30 = vst.msk [vmem:[#allocation2 + $0x28] sm:$0xff] %vm24_vm1, %v755_v26  ;;  %31 = vst.msk [vmem:[#allocation2 + $0x30] sm:$0xff] %vm24_vm1, %v755_v26  ;;  %p735_p2 = scmp.lt.s32.totalorder %s733_s16, %s729_s15 }
  0x12   :  { %656 = vmatmul.mubr.msk.bf16.gmra.mrb[4].mxu0 %vm129_vm0, %v693_v13  ;;  %664 = vmatmul.mubr.msk.bf16.gmra.mrb[4].mxu1 %vm129_vm0, %v694_v14  ;;  %32 = vst.msk [vmem:[#allocation2 + $0x38] sm:$0xff] %vm24_vm1, %v755_v26  ;;  %33 = vst.msk [vmem:[#allocation2 + $0x40] sm:$0xff] %vm24_vm1, %v755_v26 }
  0x13   :  { %34 = vst.msk [vmem:[#allocation2 + $0x48] sm:$0xff] %vm24_vm1, %v755_v26  ;;  %35 = vst.msk [vmem:[#allocation2 + $0x50] sm:$0xff] %vm24_vm1, %v755_v26  ;;  %p736_p3 = por %p735_p2, %p734_p1 }
  0x14   :  { %356 = vperm.xlu1 %676, %v310_v17   ;;  %36 = vst.msk [vmem:[#allocation2 + $0x58] sm:$0xff] %vm24_vm1, %v755_v26  ;;  %37 = vst.msk [vmem:[#allocation2 + $0x60] sm:$0xff] %vm24_vm1, %v755_v26 }
  0x15   :  { %496 = vperm.xlu0 %678, %v307_v18   ;;  %38 = vst.msk [vmem:[#allocation2 + $0x68] sm:$0xff] %vm24_vm1, %v755_v26  ;;  %39 = vst.msk [vmem:[#allocation2 + $0x70] sm:$0xff] %vm24_vm1, %v755_v26  ;;  %v43_v42 = vld [vmem:[#allocation2 + $0x10] sm:$0xff]  ;;  %p737_p4 = pnand %p736_p3, %p730_p0 }
  0x16   :  { %40 = vst.msk [vmem:[#allocation2 + $0x78] sm:$0xff] %vm24_vm1, %v755_v26  ;;  %v41_v45 = vld [vmem:[#allocation2] sm:$0xff]  ;;  %v42_v56 = vld [vmem:[#allocation2 + $0x8] sm:$0xff] }
  0x17   :  { %v44_v50 = vld [vmem:[#allocation2 + $0x18] sm:$0xff]  ;;  %v45_v8 = vld [vmem:[#allocation2 + $0x20] sm:$0xff] }
  0x18   :  { %366 = vperm.xlu1 %676, %v312_v19   ;;  %v47_v5 = vld [vmem:[#allocation2 + $0x30] sm:$0xff] }
  0x19   :  { %682 = vset.pattern.permute.xlu0 %v753_v7  ;;  %v49_v46 = vld [vmem:[#allocation2 + $0x40] sm:$0xff]  ;;  %v48_v12 = vld [vmem:[#allocation2 + $0x38] sm:$0xff] }
  0x1a   :  { %341 = vperm.xlu0 %682, %v307_v18   ;;  %v51_v43 = vld [vmem:[#allocation2 + $0x50] sm:$0xff]  ;;  %v50_v57 = vld [vmem:[#allocation2 + $0x48] sm:$0xff] }
  0x1b   :  { %v52_v51 = vld [vmem:[#allocation2 + $0x58] sm:$0xff]  ;;  %v46_v18 = vld [vmem:[#allocation2 + $0x28] sm:$0xff] }
  0x1c   :  { %677 = vset.pattern.permute.xlu1 %v754_v16  ;;  %v55_v6 = vld [vmem:[#allocation2 + $0x70] sm:$0xff] }
  0x1d   :  { %480 = vperm.xlu1 %677, %v303_v10   ;;  %v56_v13 = vld [vmem:[#allocation2 + $0x78] sm:$0xff] }
  0x1e   :  { %351 = vperm.xlu0 %682, %v309_v20  }
  0x21   :  { %679 = vset.pattern.permute.xlu1 %v753_v7 }
  0x22   :  { %376 = vperm.xlu1 %679, %v314_v21   ;;  %361 = vperm.xlu0 %682, %v311_v22  }
  0x26   :  { %680 = vset.pattern.permute.xlu1 %v754_v16  ;;  %371 = vperm.xlu0 %682, %v313_v23  }
  0x27   :  { %488 = vperm.xlu1 %680, %v305_v9   ;;  %v53_v9 = vld [vmem:[#allocation2 + $0x60] sm:$0xff] }
  0x2a   :  { %381 = vperm.xlu0 %682, %v315_v24  }
  0x2b   :  { %492 = vperm.xlu1 %680, %v306_v11  }
  0x2e   :  { %396 = vperm.xlu0 %682, %v318_v25  }
  0x2f   :  { %681 = vset.pattern.permute.xlu1 %v753_v7 }
  0x30   :  { %386 = vperm.xlu1 %681, %v316_v27  }
  0x32   :  { %684 = vset.pattern.permute.xlu0 %v754_v16 }
  0x33   :  { %512 = vperm.xlu0 %684, %v311_v22  }
  0x34   :  { %391 = vperm.xlu1 %681, %v317_v28  }
  0x37   :  { %524 = vperm.xlu0 %684, %v314_v21  }
  0x38   :  { %683 = vset.pattern.permute.xlu1 %v754_v16 }
  0x39   :  { %500 = vperm.xlu1 %683, %v308_v15  }
  0x3b   :  { %532 = vperm.xlu0 %684, %v316_v27  }
  0x3d   :  { %504 = vperm.xlu1 %683, %v309_v20  }
  0x3f   :  { %540 = vperm.xlu0 %684, %v318_v25  }
  0x41   :  { %508 = vperm.xlu1 %683, %v310_v17  }
  0x45   :  { %516 = vperm.xlu1 %683, %v312_v19   ;;  %v54_v19 = vld [vmem:[#allocation2 + $0x68] sm:$0xff] }
  0x49   :  { %520 = vperm.xlu1 %683, %v313_v23  }
  0x4d   :  { %528 = vperm.xlu1 %683, %v315_v24  }
  0x51   :  { %536 = vperm.xlu1 %683, %v317_v28  }
  0x85   :  { %v889_v29 = vpop.permute.xlu1 %331  ;;  %v897_v33 = vpop.permute.xlu0 %321 }
  0x8b   :  { %v891_v30 = vpop.permute.xlu1 %336  ;;  %v901_v35 = vpop.permute.xlu0 %326 }
  0x8f   :  { %v893_v31 = vpop.permute.xlu1 %346 }
  0x90   :  { %v905_v37 = vpop.permute.xlu0 %484 }
  0x93   :  { %v895_v32 = vpop.permute.xlu1 %356 }
  0x94   :  { %v909_v39 = vpop.permute.xlu0 %496 }
  0x97   :  { %v899_v34 = vpop.permute.xlu1 %366 }
  0x99   :  { %v913_v41 = vpop.permute.xlu0 %341 }
  0x9c   :  { %v903_v36 = vpop.permute.xlu1 %480 }
  0x9d   :  { %v917_v47 = vpop.permute.xlu0 %351 }
  0xa1   :  { %v907_v38 = vpop.permute.xlu1 %376  ;;  %v362_v4 = vpop.permute.xlu0 %361 }
  0xa6   :  { %v911_v40 = vpop.permute.xlu1 %488 }
  0xaa   :  { %v915_v44 = vpop.permute.xlu1 %492 }
  0xaf   :  { %v927_v7 = vpop.permute.xlu1 %386 }
  0xdd   :  { %v653_v48 = vpop.f32.mrb[0].mxu0  ;;  %v661_v49 = vpop.f32.mrb[0].mxu1 }
  0xde   :  { %v253_v52 = vadd.f32 %v653_v48, %v43_v42  ;;  %v261_v53 = vadd.f32 %v661_v49, %v51_v43  ;;  %v188_v54 = vpop.f32.mrb[1].mxu0  ;;  %v220_v55 = vpop.f32.mrb[1].mxu1 }
  0xdf   :  { %v251_v58 = vadd.f32 %v188_v54, %v41_v45  ;;  %v259_v59 = vadd.f32 %v220_v55, %v49_v46  ;;  %v654_v60 = vpop.f32.mrb[2].mxu0  ;;  %v662_v61 = vpop.f32.mrb[2].mxu1 }
  0xe0   :  { %270 = vst.msk [vmem:[#allocation2 + $0x10] sm:$0xff] %vm24_vm1, %v253_v52  ;;  %278 = vst.msk [vmem:[#allocation2 + $0x50] sm:$0xff] %vm24_vm1, %v261_v53  ;;  %v254_v62 = vadd.f32 %v654_v60, %v44_v50  ;;  %v262_v63 = vadd.f32 %v662_v61, %v52_v51  ;;  %v191_v0 = vpop.f32.mrb[3].mxu0  ;;  %v223_v1 = vpop.f32.mrb[3].mxu1 }
  0xe1   :  { %268 = vst.msk [vmem:[#allocation2] sm:$0xff] %vm24_vm1, %v251_v58  ;;  %276 = vst.msk [vmem:[#allocation2 + $0x40] sm:$0xff] %vm24_vm1, %v259_v59  ;;  %v252_v2 = vadd.f32 %v191_v0, %v42_v56  ;;  %v260_v3 = vadd.f32 %v223_v1, %v50_v57  ;;  %v372_v48 = vpop.permute.xlu0 %371 }
  0xe2   :  { %271 = vst.msk [vmem:[#allocation2 + $0x18] sm:$0xff] %vm24_vm1, %v254_v62  ;;  %279 = vst.msk [vmem:[#allocation2 + $0x58] sm:$0xff] %vm24_vm1, %v262_v63 }
  0xe3   :  { %269 = vst.msk [vmem:[#allocation2 + $0x8] sm:$0xff] %vm24_vm1, %v252_v2  ;;  %277 = vst.msk [vmem:[#allocation2 + $0x48] sm:$0xff] %vm24_vm1, %v260_v3 }
  0xe5   :  { %v657_v10 = vpop.f32.mrb[4].mxu0  ;;  %v665_v11 = vpop.f32.mrb[4].mxu1 }
  0xe6   :  { %v257_v14 = vadd.f32 %v657_v10, %v47_v5  ;;  %v265_v15 = vadd.f32 %v665_v11, %v55_v6  ;;  %v204_v16 = vpop.f32.mrb[5].mxu0  ;;  %v236_v17 = vpop.f32.mrb[5].mxu1 }
  0xe7   :  { %v255_v20 = vadd.f32 %v204_v16, %v45_v8  ;;  %v263_v21 = vadd.f32 %v236_v17, %v53_v9  ;;  %v658_v22 = vpop.f32.mrb[6].mxu0  ;;  %v666_v23 = vpop.f32.mrb[6].mxu1  ;;  %v297_v24 = vld [vmem:[#allocation2 + $0x50] sm:$0xff] }
  0xe8   :  { %v289_v25 = vld [vmem:[#allocation2 + $0x10] sm:$0xff]  ;;  %v295_v26 = vld [vmem:[#allocation2 + $0x40] sm:$0xff]  ;;  %274 = vst.msk [vmem:[#allocation2 + $0x30] sm:$0xff] %vm24_vm1, %v257_v14  ;;  %282 = vst.msk [vmem:[#allocation2 + $0x70] sm:$0xff] %vm24_vm1, %v265_v15  ;;  %v258_v27 = vadd.f32 %v658_v22, %v48_v12  ;;  %v266_v28 = vadd.f32 %v666_v23, %v56_v13  ;;  %v207_v42 = vpop.f32.mrb[7].mxu0  ;;  %v239_v46 = vpop.f32.mrb[7].mxu1  ;;  %v409_v53 = vadd.f32 %v372_v48, %v297_v24 }
  0xe9   :  { %v287_v43 = vld [vmem:[#allocation2] sm:$0xff]  ;;  %v401_v45 = vadd.f32 %v889_v29, %v289_v25  ;;  %272 = vst.msk [vmem:[#allocation2 + $0x20] sm:$0xff] %vm24_vm1, %v255_v20  ;;  %280 = vst.msk [vmem:[#allocation2 + $0x60] sm:$0xff] %vm24_vm1, %v263_v21  ;;  %v256_v49 = vadd.f32 %v207_v42, %v46_v18  ;;  %v290_v50 = vld [vmem:[#allocation2 + $0x18] sm:$0xff]  ;;  %v264_v52 = vadd.f32 %v239_v46, %v54_v19  ;;  %v392_v29 = vpop.permute.xlu1 %391  ;;  %v382_v5 = vpop.permute.xlu0 %381 }
  0xea   :  { %v399_v51 = vadd.f32 %v897_v33, %v287_v43  ;;  %275 = vst.msk [vmem:[#allocation2 + $0x38] sm:$0xff] %vm24_vm1, %v258_v27  ;;  %283 = vst.msk [vmem:[#allocation2 + $0x78] sm:$0xff] %vm24_vm1, %v266_v28  ;;  %v288_v54 = vld [vmem:[#allocation2 + $0x8] sm:$0xff]  ;;  %v402_v55 = vadd.f32 %v891_v30, %v290_v50  ;;  %v407_v56 = vadd.f32 %v362_v4, %v295_v26  ;;  %v425_v62 = vmul.f32 0.5, %v409_v53  ;;  %v298_v3 = vld [vmem:[#allocation2 + $0x58] sm:$0xff] }
  0xeb   :  { %273 = vst.msk [vmem:[#allocation2 + $0x28] sm:$0xff] %vm24_vm1, %v256_v49  ;;  %v400_v57 = vadd.f32 %v901_v35, %v288_v54  ;;  %281 = vst.msk [vmem:[#allocation2 + $0x68] sm:$0xff] %vm24_vm1, %v264_v52  ;;  %v296_v59 = vld [vmem:[#allocation2 + $0x48] sm:$0xff]  ;;  %v417_v33 = vmul.f32 0.5, %v401_v45  ;;  %v410_v13 = vadd.f32 %v907_v38, %v298_v3 }
  0xec   :  { %v415_v58 = vmul.f32 0.5, %v399_v51  ;;  %v418_v61 = vmul.f32 0.5, %v402_v55  ;;  %v408_v63 = vadd.f32 %v899_v34, %v296_v59  ;;  %v423_v0 = vmul.f32 0.5, %v407_v56 }
  0xed   :  { %v416_v60 = vmul.f32 0.5, %v400_v57  ;;  %v943_v35 = vpop.permute.xlu1 %500  ;;  %v397_v19 = vpop.permute.xlu0 %396  ;;  %v426_v20 = vmul.f32 0.5, %v410_v13 }
  0xee   :  { %695 = vtanh.f32 %v415_v58  ;;  %v424_v11 = vmul.f32 0.5, %v408_v63 }
  0xef   :  { %v293_v1 = vld [vmem:[#allocation2 + $0x30] sm:$0xff]  ;;  %697 = vtanh.f32 %v416_v60 }
  0xf0   :  { %v291_v30 = vld [vmem:[#allocation2 + $0x20] sm:$0xff]  ;;  %v405_v2 = vadd.f32 %v917_v47, %v293_v1  ;;  %699 = vtanh.f32 %v417_v33  ;;  %v301_v17 = vld [vmem:[#allocation2 + $0x70] sm:$0xff] }
  0xf1   :  { %v403_v4 = vadd.f32 %v913_v41, %v291_v30  ;;  %701 = vtanh.f32 %v418_v61  ;;  %v294_v6 = vld [vmem:[#allocation2 + $0x38] sm:$0xff]  ;;  %v299_v10 = vld [vmem:[#allocation2 + $0x60] sm:$0xff]  ;;  %v949_v18 = vpop.permute.xlu1 %504  ;;  %v413_v24 = vadd.f32 %v392_v29, %v301_v17 }
  0xf2   :  { %703 = vtanh.f32 %v425_v62  ;;  %v292_v8 = vld [vmem:[#allocation2 + $0x28] sm:$0xff]  ;;  %v421_v9 = vmul.f32 0.5, %v405_v2  ;;  %v406_v34 = vadd.f32 %v895_v32, %v294_v6  ;;  %v411_v16 = vadd.f32 %v382_v5, %v299_v10  ;;  %v302_v32 = vld [vmem:[#allocation2 + $0x78] sm:$0xff] }
  0xf3   :  { %705 = vtanh.f32 %v423_v0  ;;  %v404_v12 = vadd.f32 %v893_v31, %v292_v8  ;;  %v419_v47 = vmul.f32 0.5, %v403_v4  ;;  %v300_v15 = vld [vmem:[#allocation2 + $0x68] sm:$0xff]  ;;  %v414_v27 = vadd.f32 %v397_v19, %v302_v32  ;;  %v513_v8 = vpop.permute.xlu0 %512 }
  0xf4   :  { %707 = vtanh.f32 %v421_v9  ;;  %v422_v14 = vmul.f32 0.5, %v406_v34  ;;  %v412_v21 = vadd.f32 %v927_v7, %v300_v15  ;;  %v427_v23 = vmul.f32 0.5, %v411_v16 }
  0xf5   :  { %v420_v41 = vmul.f32 0.5, %v404_v12  ;;  %709 = vtanh.f32 %v419_v47  ;;  %v509_v52 = vpop.permute.xlu1 %508  ;;  %v429_v53 = vmul.f32 0.5, %v413_v24  ;;  %v430_v59 = vmul.f32 0.5, %v414_v27 }
  0xf6   :  { %711 = vtanh.f32 %v424_v11  ;;  %v428_v45 = vmul.f32 0.5, %v412_v21 }
  0xf7   :  { %713 = vtanh.f32 %v420_v41 }
  0xf8   :  { %v696_v31 = vpop.eup %695  ;;  %715 = vtanh.f32 %v422_v14 }
  0xf9   :  { %v698_v22 = vpop.eup %697  ;;  %v447_v38 = vmul.f32 0.5, %v696_v31  ;;  %717 = vtanh.f32 %v426_v20  ;;  %v517_v6 = vpop.permute.xlu1 %516 }
  0xfa   :  { %v700_v25 = vpop.eup %699  ;;  %v448_v26 = vmul.f32 0.5, %v698_v22  ;;  %719 = vtanh.f32 %v427_v23  ;;  %v525_v23 = vpop.permute.xlu0 %524 }
  0xfb   :  { %v702_v28 = vpop.eup %701  ;;  %v449_v42 = vmul.f32 0.5, %v700_v25  ;;  %v463_v43 = vadd.f32 0.5, %v447_v38  ;;  %721 = vtanh.f32 %v428_v45 }
  0xfc   :  { %v704_v46 = vpop.eup %703  ;;  %v450_v48 = vmul.f32 0.5, %v702_v28  ;;  %v464_v49 = vadd.f32 0.5, %v448_v26  ;;  %723 = vtanh.f32 %v429_v53 }
  0xfd   :  { %v706_v50 = vpop.eup %705  ;;  %v465_v51 = vadd.f32 0.5, %v449_v42  ;;  %v543_v7 = vmul.f32 %v903_v36, %v463_v43  ;;  %725 = vtanh.f32 %v430_v59  ;;  %v457_v13 = vmul.f32 0.5, %v704_v46  ;;  %v521_v38 = vpop.permute.xlu1 %520 }
  0xfe   :  { %v708_v54 = vpop.eup %707  ;;  %v466_v55 = vadd.f32 0.5, %v450_v48  ;;  %v544_v29 = vmul.f32 %v905_v37, %v464_v49  ;;  %v455_v1 = vmul.f32 0.5, %v706_v50 }
  0xff   :  { %v710_v56 = vpop.eup %709  ;;  %v453_v57 = vmul.f32 0.5, %v708_v54  ;;  %v545_v58 = vmul.f32 %v911_v40, %v465_v51  ;;  %v559_v62 = vsel %vm24_vm1, %v543_v7, 0.0  ;;  %v473_v25 = vadd.f32 0.5, %v457_v13  ;;  %v533_v54 = vpop.permute.xlu0 %532 }
 0x100   :  { %v712_v33 = vpop.eup %711  ;;  %v451_v60 = vmul.f32 0.5, %v710_v56  ;;  %v546_v61 = vmul.f32 %v915_v44, %v466_v55  ;;  %v560_v36 = vsel %vm24_vm1, %v544_v29, 0.0  ;;  %v471_v16 = vadd.f32 0.5, %v455_v1 }
 0x101   :  { %v714_v63 = vpop.eup %713  ;;  %v561_v0 = vadd.f32 %v560_v36, %v559_v62  ;;  %v469_v3 = vadd.f32 0.5, %v453_v57  ;;  %v562_v40 = vsel %vm24_vm1, %v545_v58, 0.0  ;;  %v456_v34 = vmul.f32 0.5, %v712_v33  ;;  %v529_v53 = vpop.permute.xlu1 %528 }
 0x102   :  { %v716_v30 = vpop.eup %715  ;;  %v452_v37 = vmul.f32 0.5, %v714_v63  ;;  %v467_v2 = vadd.f32 0.5, %v451_v60  ;;  %v564_v10 = vsel %vm24_vm1, %v546_v61, 0.0  ;;  %v553_v49 = vmul.f32 %v521_v38, %v473_v25 }
 0x103   :  { %v563_v4 = vadd.f32 %v562_v40, %v561_v0  ;;  %v454_v5 = vmul.f32 0.5, %v716_v30  ;;  %v718_v11 = vpop.eup %717  ;;  %v549_v15 = vmul.f32 %v949_v18, %v469_v3  ;;  %v541_v30 = vpop.permute.xlu0 %540  ;;  %v597_v13 = vstv %s993_s3 }
 0x104   :  { %v468_v44 = vadd.f32 0.5, %v452_v37  ;;  %v547_v9 = vmul.f32 %v909_v39, %v467_v2  ;;  %v720_v17 = vpop.eup %719  ;;  %v472_v39 = vadd.f32 0.5, %v456_v34  ;;  %v458_v21 = vmul.f32 0.5, %v718_v11 }
 0x105   :  { %v565_v12 = vadd.f32 %v564_v10, %v563_v4  ;;  %v470_v47 = vadd.f32 0.5, %v454_v5  ;;  %v722_v31 = vpop.eup %721  ;;  %v570_v24 = vsel %vm24_vm1, %v549_v15, 0.0  ;;  %v459_v26 = vmul.f32 0.5, %v720_v17  ;;  %v537_v1 = vpop.permute.xlu1 %536 }
 0x106   :  { %v548_v14 = vmul.f32 %v943_v35, %v468_v44  ;;  %v566_v41 = vsel %vm24_vm1, %v547_v9, 0.0  ;;  %v551_v35 = vmul.f32 %v513_v8, %v471_v16  ;;  %v724_v18 = vpop.eup %723  ;;  %v552_v42 = vmul.f32 %v517_v6, %v472_v39 }
 0x107   :  { %v567_v19 = vadd.f32 %v566_v41, %v565_v12  ;;  %v550_v20 = vmul.f32 %v509_v52, %v470_v47  ;;  %v474_v43 = vadd.f32 0.5, %v458_v21  ;;  %v460_v45 = vmul.f32 0.5, %v722_v31  ;;  %v726_v46 = vpop.eup %725 }
 0x108   :  { %v568_v32 = vsel %vm24_vm1, %v548_v14, 0.0  ;;  %v574_v50 = vsel %vm24_vm1, %v551_v35, 0.0  ;;  %v475_v51 = vadd.f32 0.5, %v459_v26  ;;  %v461_v7 = vmul.f32 0.5, %v724_v18 }
 0x109   :  { %v569_v22 = vadd.f32 %v568_v32, %v567_v19  ;;  %v572_v28 = vsel %vm24_vm1, %v550_v20, 0.0  ;;  %v576_v55 = vsel %vm24_vm1, %v552_v42, 0.0  ;;  %v554_v29 = vmul.f32 %v525_v23, %v474_v43 }
 0x10a   :  { %v476_v56 = vadd.f32 0.5, %v460_v45  ;;  %v462_v57 = vmul.f32 0.5, %v726_v46  ;;  %v578_v59 = vsel %vm24_vm1, %v553_v49, 0.0  ;;  %v555_v33 = vmul.f32 %v529_v53, %v475_v51 }
 0x10b   :  { %v571_v27 = vadd.f32 %v570_v24, %v569_v22  ;;  %v477_v60 = vadd.f32 0.5, %v461_v7  ;;  %v580_v62 = vsel %vm24_vm1, %v554_v29, 0.0 }
 0x10c   :  { %v556_v36 = vmul.f32 %v533_v54, %v476_v56  ;;  %v478_v63 = vadd.f32 0.5, %v462_v57  ;;  %v582_v37 = vsel %vm24_vm1, %v555_v33, 0.0 }
 0x10d   :  { %v573_v48 = vadd.f32 %v572_v28, %v571_v27  ;;  %v557_v2 = vmul.f32 %v537_v1, %v477_v60 }
 0x10e   :  { %v584_v40 = vsel %vm24_vm1, %v556_v36, 0.0  ;;  %v558_v4 = vmul.f32 %v541_v30, %v478_v63 }
 0x10f   :  { %v575_v52 = vadd.f32 %v574_v50, %v573_v48  ;;  %v586_v6 = vsel %vm24_vm1, %v557_v2, 0.0 }
 0x110   :  { %v588_v44 = vsel %vm24_vm1, %v558_v4, 0.0 }
 0x111   :  { %v577_v58 = vadd.f32 %v576_v55, %v575_v52 }
 0x113   :  { %v579_v61 = vadd.f32 %v578_v59, %v577_v58 }
 0x115   :  { %v581_v0 = vadd.f32 %v580_v62, %v579_v61 }
 0x117   :  { %v583_v3 = vadd.f32 %v582_v37, %v581_v0 }
 0x119   :  { %v585_v5 = vadd.f32 %v584_v40, %v583_v3 }
 0x11b   :  { %v587_v8 = vadd.f32 %v586_v6, %v585_v5 }
 0x11d   :  { %v589_v9 = vadd.f32 %v588_v44, %v587_v8 }
 0x11f   :  { %v590_v10 = vrot.slane %v589_v9, 4 }
 0x121   :  { %v591_v34 = vadd.f32 %v590_v10, %v589_v9 }
 0x123   :  { %v592_v11 = vrot.slane %v591_v34, 2 }
 0x125   :  { %v593_v12 = vadd.f32 %v592_v11, %v591_v34 }
 0x127   :  { %v594_v47 = vrot.slane %v593_v12, 1 }
 0x129   :  { %v595_v14 = vadd.f32 %v594_v47, %v593_v12 }
 0x12b   :  { %v598_v15 = vadd.f32 %v597_v13, %v595_v14 }
 0x12d   :  { %v599_v41 = vmul.f32 0.5, %v598_v15 }
 0x12f   :  { %727 = vtanh.f32 %v599_v41 }
 0x139   :  { %v728_v16 = vpop.eup %727 }
 0x13a   :  { %v601_v17 = vmul.f32 0.5, %v728_v16 }
 0x13c   :  { %v602_v19 = vadd.f32 0.5, %v601_v17 }
 0x13e   :  { %604 = vst.msk [vmem:[#allocation4] sm:$0x1] %vm603_vm2, %v602_v19 }
 0x13f   :  { %740 = shalt.err (!%p737_p4)
}
 0x140   :  { %s741_s18 = scalar_lea.hbm %s994_s4, 16 }
 0x141   :  { %p742_p5 = scmp.ne.s32.totalorder %s994_s4, %s741_s18  ;;  %p745_p6 = scmp.lt.u32.totalorder %s741_s18, %s994_s4 }
 0x143   :  { %p747_p7 = pnand %p745_p6, %p742_p5 }
 0x145   :  { %750 = shalt.err (!%p747_p7)
}
 0x146   :  { %614 = dma.vmem_to_hbm [thread:$0]  %s612_s14, 16, %s994_s4, [#allocation5]  }
 0x147   :  { %751 = dma.done.wait [#allocation5], 16  }
 0x148   :  { %752 = vsyncadd [#allocation5], 4294967280 }
 0x149   :  { %618 = vsyncpa [#allocation5], 1 }

// kernel: tpu_custom_call.1
= control target key start
LH: loop header
LB: loop body
LE: loop exit
PB: predicated region body
PF: predicated region fallthrough
CT: control target
= control target key end

     0   :  { %vm129_vm0 = vcmask 261120   ;;  %v753_v7 = vmov 0   ;;  %s990_s0 = inlined_call_operand.vmem [shape: bf16[32,8], index: 0, kind: input, shape index: {}]   ;;  %s991_s1 = inlined_call_operand.vmem [shape: bf16[128,32], index: 1, kind: input, shape index: {}]   ;;  %s992_s2 = inlined_call_operand.vmem [shape: f32[128,2], index: 2, kind: input, shape index: {}]   ;;  %s993_s3 = inlined_call_operand.<no memory space> [shape: f32[1], index: 3, kind: input, shape index: {}]   ;;  %s994_s4 = inlined_call_operand.hbm [shape: f32[1,8], index: 4, kind: output, shape index: {}]  }
   0x1   :  { %v685_v0 = vld [vmem:[%s990_s0] sm:$0xff]   ;;  %v686_v1 = vld [vmem:[%s990_s0 + $0x8] sm:$0xff]   ;;  %v691_v6 = vld [vmem:[%s991_s1 + $0x10] sm:$0xff]   ;;  %676 = vset.pattern.permute.xlu1 %v753_v7  ;;  %675 = vset.pattern.permute.xlu0 %v753_v7 }
   0x2   :  { %647 = vmatprep.subr.bf16.mxu0 %v685_v0  ;;  %667 = vmatprep.subr.bf16.mxu1 %v685_v0  ;;  %v687_v2 = vld [vmem:[%s991_s1] sm:$0xff]   ;;  %v689_v4 = vld [vmem:[%s991_s1 + $0x8] sm:$0xff]   ;;  %v692_v8 = vld [vmem:[%s991_s1 + $0x30] sm:$0xff]  }
   0x3   :  { %648 = vmatpush3.bf16.msra.mxu0 %v685_v0  ;;  %669 = vmatpush3.bf16.msra.mxu1 %v685_v0  ;;  %v688_v3 = vld [vmem:[%s991_s1 + $0x20] sm:$0xff]   ;;  %v690_v5 = vld [vmem:[%s991_s1 + $0x28] sm:$0xff]   ;;  %v305_v9 = vld [vmem:[%s992_s2 + $0x10] sm:$0xff] }
   0x4   :  { %649 = vmatprep.subr.bf16.mxu0 %v686_v1  ;;  %668 = vmatprep.subr.bf16.mxu1 %v686_v1  ;;  %v303_v10 = vld [vmem:[%s992_s2] sm:$0xff]  ;;  %v306_v11 = vld [vmem:[%s992_s2 + $0x18] sm:$0xff]  ;;  %v304_v12 = vld [vmem:[%s992_s2 + $0x8] sm:$0xff] }
   0x5   :  { %651 = vmatprep.mubr.msk.bf16.mxu0 %vm129_vm0, %v687_v2  ;;  %659 = vmatprep.mubr.msk.bf16.mxu1 %vm129_vm0, %v688_v3  ;;  %v693_v13 = vld [vmem:[%s991_s1 + $0x18] sm:$0xff]  }
   0x6   :  { %331 = vperm.xlu1 %676, %v305_v9   ;;  %321 = vperm.xlu0 %675, %v303_v10   ;;  %v694_v14 = vld [vmem:[%s991_s1 + $0x38] sm:$0xff]  }
   0x7   :  { %650 = vmatpush3.bf16.msra.mxu0 %v686_v1  ;;  %670 = vmatpush3.bf16.msra.mxu1 %v686_v1 }
   0xa   :  { %652 = vmatmul.mubr.msk.bf16.vlgmr.msra.gmra.mrb[0].mxu0 %vm129_vm0, %v689_v4  ;;  %660 = vmatmul.mubr.msk.bf16.vlgmr.msra.gmra.mrb[0].mxu1 %vm129_vm0, %v690_v5 }
   0xb   :  { %655 = vmatprep.mubr.msk.bf16.mxu0 %vm129_vm0, %v691_v6  ;;  %663 = vmatprep.mubr.msk.bf16.mxu1 %vm129_vm0, %v692_v8 }
   0xc   :  { %10 = vsyncpa [#allocation5], 0  ;;  %336 = vperm.xlu1 %676, %v306_v11   ;;  %326 = vperm.xlu0 %675, %v304_v12   ;;  %v308_v15 = vld [vmem:[%s992_s2 + $0x28] sm:$0xff]  ;;  %v754_v16 = vmov 1   ;;  %v310_v17 = vld [vmem:[%s992_s2 + $0x38] sm:$0xff]  ;;  %vm24_vm1 = vcmask 64512  }
   0xd   :  { %v307_v18 = vld [vmem:[%s992_s2 + $0x20] sm:$0xff]  ;;  %v312_v19 = vld [vmem:[%s992_s2 + $0x48] sm:$0xff]  ;;  %v309_v20 = vld [vmem:[%s992_s2 + $0x30] sm:$0xff]  ;;  %v755_v26 = vmov 0.0   ;;  %s756_s13 = smov [#allocation4]   ;;  %vm603_vm2 = vcmask 57344  }
   0xe   :  { %v314_v21 = vld [vmem:[%s992_s2 + $0x58] sm:$0xff]  ;;  %v311_v22 = vld [vmem:[%s992_s2 + $0x40] sm:$0xff]  ;;  %v313_v23 = vld [vmem:[%s992_s2 + $0x50] sm:$0xff]  ;;  %27 = vst.msk [vmem:[#allocation2 + $0x10] sm:$0xff] %vm24_vm1, %v755_v26  ;;  %s611_s14 = sshll.u32 %s756_s13, 4  ;;  %s612_s14 = int_to_ptr.vmem [resolvable:$true] %s611_s14 }
   0xf   :  { %v315_v24 = vld [vmem:[%s992_s2 + $0x60] sm:$0xff]  ;;  %v318_v25 = vld [vmem:[%s992_s2 + $0x78] sm:$0xff]  ;;  %25 = vst.msk [vmem:[#allocation2] sm:$0xff] %vm24_vm1, %v755_v26  ;;  %26 = vst.msk [vmem:[#allocation2 + $0x8] sm:$0xff] %vm24_vm1, %v755_v26  ;;  %s729_s15 = scalar_lea.vmem %s612_s14, 16  ;;  %s733_s16 = scalar_lea.vmem %s612_s14, 32 }
  0x10   :  { %346 = vperm.xlu1 %676, %v308_v15   ;;  %678 = vset.pattern.permute.xlu0 %v754_v16  ;;  %28 = vst.msk [vmem:[#allocation2 + $0x18] sm:$0xff] %vm24_vm1, %v755_v26  ;;  %29 = vst.msk [vmem:[#allocation2 + $0x20] sm:$0xff] %vm24_vm1, %v755_v26  ;;  %v316_v27 = vld [vmem:[%s992_s2 + $0x68] sm:$0xff]  ;;  %v317_v28 = vld [vmem:[%s992_s2 + $0x70] sm:$0xff]  ;;  %p730_p0 = scmp.ne.s32.totalorder %s612_s14, %s729_s15  ;;  %p734_p1 = scmp.lt.s32.totalorder %s612_s14, %s612_s14 }
  0x11   :  { %484 = vperm.xlu0 %678, %v304_v12   ;;  %30 = vst.msk [vmem:[#allocation2 + $0x28] sm:$0xff] %vm24_vm1, %v755_v26  ;;  %31 = vst.msk [vmem:[#allocation2 + $0x30] sm:$0xff] %vm24_vm1, %v755_v26  ;;  %p735_p2 = scmp.lt.s32.totalorder %s733_s16, %s729_s15 }
  0x12   :  { %656 = vmatmul.mubr.msk.bf16.gmra.mrb[4].mxu0 %vm129_vm0, %v693_v13  ;;  %664 = vmatmul.mubr.msk.bf16.gmra.mrb[4].mxu1 %vm129_vm0, %v694_v14  ;;  %32 = vst.msk [vmem:[#allocation2 + $0x38] sm:$0xff] %vm24_vm1, %v755_v26  ;;  %33 = vst.msk [vmem:[#allocation2 + $0x40] sm:$0xff] %vm24_vm1, %v755_v26 }
  0x13   :  { %34 = vst.msk [vmem:[#allocation2 + $0x48] sm:$0xff] %vm24_vm1, %v755_v26  ;;  %35 = vst.msk [vmem:[#allocation2 + $0x50] sm:$0xff] %vm24_vm1, %v755_v26  ;;  %p736_p3 = por %p735_p2, %p734_p1 }
  0x14   :  { %356 = vperm.xlu1 %676, %v310_v17   ;;  %36 = vst.msk [vmem:[#allocation2 + $0x58] sm:$0xff] %vm24_vm1, %v755_v26  ;;  %37 = vst.msk [vmem:[#allocation2 + $0x60] sm:$0xff] %vm24_vm1, %v755_v26 }
  0x15   :  { %496 = vperm.xlu0 %678, %v307_v18   ;;  %38 = vst.msk [vmem:[#allocation2 + $0x68] sm:$0xff] %vm24_vm1, %v755_v26  ;;  %39 = vst.msk [vmem:[#allocation2 + $0x70] sm:$0xff] %vm24_vm1, %v755_v26  ;;  %v43_v42 = vld [vmem:[#allocation2 + $0x10] sm:$0xff]  ;;  %p737_p4 = pnand %p736_p3, %p730_p0 }
  0x16   :  { %40 = vst.msk [vmem:[#allocation2 + $0x78] sm:$0xff] %vm24_vm1, %v755_v26  ;;  %v41_v45 = vld [vmem:[#allocation2] sm:$0xff]  ;;  %v42_v56 = vld [vmem:[#allocation2 + $0x8] sm:$0xff] }
  0x17   :  { %v44_v50 = vld [vmem:[#allocation2 + $0x18] sm:$0xff]  ;;  %v45_v8 = vld [vmem:[#allocation2 + $0x20] sm:$0xff] }
  0x18   :  { %366 = vperm.xlu1 %676, %v312_v19   ;;  %v47_v5 = vld [vmem:[#allocation2 + $0x30] sm:$0xff] }
  0x19   :  { %682 = vset.pattern.permute.xlu0 %v753_v7  ;;  %v49_v46 = vld [vmem:[#allocation2 + $0x40] sm:$0xff]  ;;  %v48_v12 = vld [vmem:[#allocation2 + $0x38] sm:$0xff] }
  0x1a   :  { %341 = vperm.xlu0 %682, %v307_v18   ;;  %v51_v43 = vld [vmem:[#allocation2 + $0x50] sm:$0xff]  ;;  %v50_v57 = vld [vmem:[#allocation2 + $0x48] sm:$0xff] }
  0x1b   :  { %v52_v51 = vld [vmem:[#allocation2 + $0x58] sm:$0xff]  ;;  %v46_v18 = vld [vmem:[#allocation2 + $0x28] sm:$0xff] }
  0x1c   :  { %677 = vset.pattern.permute.xlu1 %v754_v16  ;;  %v55_v6 = vld [vmem:[#allocation2 + $0x70] sm:$0xff] }
  0x1d   :  { %480 = vperm.xlu1 %677, %v303_v10   ;;  %v56_v13 = vld [vmem:[#allocation2 + $0x78] sm:$0xff] }
  0x1e   :  { %351 = vperm.xlu0 %682, %v309_v20  }
  0x21   :  { %679 = vset.pattern.permute.xlu1 %v753_v7 }
  0x22   :  { %376 = vperm.xlu1 %679, %v314_v21   ;;  %361 = vperm.xlu0 %682, %v311_v22  }
  0x26   :  { %680 = vset.pattern.permute.xlu1 %v754_v16  ;;  %371 = vperm.xlu0 %682, %v313_v23  }
  0x27   :  { %488 = vperm.xlu1 %680, %v305_v9   ;;  %v53_v9 = vld [vmem:[#allocation2 + $0x60] sm:$0xff] }
  0x2a   :  { %381 = vperm.xlu0 %682, %v315_v24  }
  0x2b   :  { %492 = vperm.xlu1 %680, %v306_v11  }
  0x2e   :  { %396 = vperm.xlu0 %682, %v318_v25  }
  0x2f   :  { %681 = vset.pattern.permute.xlu1 %v753_v7 }
  0x30   :  { %386 = vperm.xlu1 %681, %v316_v27  }
  0x32   :  { %684 = vset.pattern.permute.xlu0 %v754_v16 }
  0x33   :  { %512 = vperm.xlu0 %684, %v311_v22  }
  0x34   :  { %391 = vperm.xlu1 %681, %v317_v28  }
  0x37   :  { %524 = vperm.xlu0 %684, %v314_v21  }
  0x38   :  { %683 = vset.pattern.permute.xlu1 %v754_v16 }
  0x39   :  { %500 = vperm.xlu1 %683, %v308_v15  }
  0x3b   :  { %532 = vperm.xlu0 %684, %v316_v27  }
  0x3d   :  { %504 = vperm.xlu1 %683, %v309_v20  }
  0x3f   :  { %540 = vperm.xlu0 %684, %v318_v25  }
  0x41   :  { %508 = vperm.xlu1 %683, %v310_v17  }
  0x45   :  { %516 = vperm.xlu1 %683, %v312_v19   ;;  %v54_v19 = vld [vmem:[#allocation2 + $0x68] sm:$0xff] }
  0x49   :  { %520 = vperm.xlu1 %683, %v313_v23  }
  0x4d   :  { %528 = vperm.xlu1 %683, %v315_v24  }
  0x51   :  { %536 = vperm.xlu1 %683, %v317_v28  }
  0x85   :  { %v889_v29 = vpop.permute.xlu1 %331  ;;  %v897_v33 = vpop.permute.xlu0 %321 }
  0x8b   :  { %v891_v30 = vpop.permute.xlu1 %336  ;;  %v901_v35 = vpop.permute.xlu0 %326 }
  0x8f   :  { %v893_v31 = vpop.permute.xlu1 %346 }
  0x90   :  { %v905_v37 = vpop.permute.xlu0 %484 }
  0x93   :  { %v895_v32 = vpop.permute.xlu1 %356 }
  0x94   :  { %v909_v39 = vpop.permute.xlu0 %496 }
  0x97   :  { %v899_v34 = vpop.permute.xlu1 %366 }
  0x99   :  { %v913_v41 = vpop.permute.xlu0 %341 }
  0x9c   :  { %v903_v36 = vpop.permute.xlu1 %480 }
  0x9d   :  { %v917_v47 = vpop.permute.xlu0 %351 }
  0xa1   :  { %v907_v38 = vpop.permute.xlu1 %376  ;;  %v362_v4 = vpop.permute.xlu0 %361 }
  0xa6   :  { %v911_v40 = vpop.permute.xlu1 %488 }
  0xaa   :  { %v915_v44 = vpop.permute.xlu1 %492 }
  0xaf   :  { %v927_v7 = vpop.permute.xlu1 %386 }
  0xdd   :  { %v653_v48 = vpop.f32.mrb[0].mxu0  ;;  %v661_v49 = vpop.f32.mrb[0].mxu1 }
  0xde   :  { %v253_v52 = vadd.f32 %v653_v48, %v43_v42  ;;  %v261_v53 = vadd.f32 %v661_v49, %v51_v43  ;;  %v188_v54 = vpop.f32.mrb[1].mxu0  ;;  %v220_v55 = vpop.f32.mrb[1].mxu1 }
  0xdf   :  { %v251_v58 = vadd.f32 %v188_v54, %v41_v45  ;;  %v259_v59 = vadd.f32 %v220_v55, %v49_v46  ;;  %v654_v60 = vpop.f32.mrb[2].mxu0  ;;  %v662_v61 = vpop.f32.mrb[2].mxu1 }
  0xe0   :  { %270 = vst.msk [vmem:[#allocation2 + $0x10] sm:$0xff] %vm24_vm1, %v253_v52  ;;  %278 = vst.msk [vmem:[#allocation2 + $0x50] sm:$0xff] %vm24_vm1, %v261_v53  ;;  %v254_v62 = vadd.f32 %v654_v60, %v44_v50  ;;  %v262_v63 = vadd.f32 %v662_v61, %v52_v51  ;;  %v191_v0 = vpop.f32.mrb[3].mxu0  ;;  %v223_v1 = vpop.f32.mrb[3].mxu1 }
  0xe1   :  { %268 = vst.msk [vmem:[#allocation2] sm:$0xff] %vm24_vm1, %v251_v58  ;;  %276 = vst.msk [vmem:[#allocation2 + $0x40] sm:$0xff] %vm24_vm1, %v259_v59  ;;  %v252_v2 = vadd.f32 %v191_v0, %v42_v56  ;;  %v260_v3 = vadd.f32 %v223_v1, %v50_v57  ;;  %v372_v48 = vpop.permute.xlu0 %371 }
  0xe2   :  { %271 = vst.msk [vmem:[#allocation2 + $0x18] sm:$0xff] %vm24_vm1, %v254_v62  ;;  %279 = vst.msk [vmem:[#allocation2 + $0x58] sm:$0xff] %vm24_vm1, %v262_v63 }
  0xe3   :  { %269 = vst.msk [vmem:[#allocation2 + $0x8] sm:$0xff] %vm24_vm1, %v252_v2  ;;  %277 = vst.msk [vmem:[#allocation2 + $0x48] sm:$0xff] %vm24_vm1, %v260_v3 }
  0xe5   :  { %v657_v10 = vpop.f32.mrb[4].mxu0  ;;  %v665_v11 = vpop.f32.mrb[4].mxu1 }
  0xe6   :  { %v257_v14 = vadd.f32 %v657_v10, %v47_v5  ;;  %v265_v15 = vadd.f32 %v665_v11, %v55_v6  ;;  %v204_v16 = vpop.f32.mrb[5].mxu0  ;;  %v236_v17 = vpop.f32.mrb[5].mxu1 }
  0xe7   :  { %v255_v20 = vadd.f32 %v204_v16, %v45_v8  ;;  %v263_v21 = vadd.f32 %v236_v17, %v53_v9  ;;  %v658_v22 = vpop.f32.mrb[6].mxu0  ;;  %v666_v23 = vpop.f32.mrb[6].mxu1  ;;  %v297_v24 = vld [vmem:[#allocation2 + $0x50] sm:$0xff] }
  0xe8   :  { %v289_v25 = vld [vmem:[#allocation2 + $0x10] sm:$0xff]  ;;  %v295_v26 = vld [vmem:[#allocation2 + $0x40] sm:$0xff]  ;;  %274 = vst.msk [vmem:[#allocation2 + $0x30] sm:$0xff] %vm24_vm1, %v257_v14  ;;  %282 = vst.msk [vmem:[#allocation2 + $0x70] sm:$0xff] %vm24_vm1, %v265_v15  ;;  %v258_v27 = vadd.f32 %v658_v22, %v48_v12  ;;  %v266_v28 = vadd.f32 %v666_v23, %v56_v13  ;;  %v207_v42 = vpop.f32.mrb[7].mxu0  ;;  %v239_v46 = vpop.f32.mrb[7].mxu1  ;;  %v409_v53 = vadd.f32 %v372_v48, %v297_v24 }
  0xe9   :  { %v287_v43 = vld [vmem:[#allocation2] sm:$0xff]  ;;  %v401_v45 = vadd.f32 %v889_v29, %v289_v25  ;;  %272 = vst.msk [vmem:[#allocation2 + $0x20] sm:$0xff] %vm24_vm1, %v255_v20  ;;  %280 = vst.msk [vmem:[#allocation2 + $0x60] sm:$0xff] %vm24_vm1, %v263_v21  ;;  %v256_v49 = vadd.f32 %v207_v42, %v46_v18  ;;  %v290_v50 = vld [vmem:[#allocation2 + $0x18] sm:$0xff]  ;;  %v264_v52 = vadd.f32 %v239_v46, %v54_v19  ;;  %v392_v29 = vpop.permute.xlu1 %391  ;;  %v382_v5 = vpop.permute.xlu0 %381 }
  0xea   :  { %v399_v51 = vadd.f32 %v897_v33, %v287_v43  ;;  %275 = vst.msk [vmem:[#allocation2 + $0x38] sm:$0xff] %vm24_vm1, %v258_v27  ;;  %283 = vst.msk [vmem:[#allocation2 + $0x78] sm:$0xff] %vm24_vm1, %v266_v28  ;;  %v288_v54 = vld [vmem:[#allocation2 + $0x8] sm:$0xff]  ;;  %v402_v55 = vadd.f32 %v891_v30, %v290_v50  ;;  %v407_v56 = vadd.f32 %v362_v4, %v295_v26  ;;  %v425_v62 = vmul.f32 0.5, %v409_v53  ;;  %v298_v3 = vld [vmem:[#allocation2 + $0x58] sm:$0xff] }
  0xeb   :  { %273 = vst.msk [vmem:[#allocation2 + $0x28] sm:$0xff] %vm24_vm1, %v256_v49  ;;  %v400_v57 = vadd.f32 %v901_v35, %v288_v54  ;;  %281 = vst.msk [vmem:[#allocation2 + $0x68] sm:$0xff] %vm24_vm1, %v264_v52  ;;  %v296_v59 = vld [vmem:[#allocation2 + $0x48] sm:$0xff]  ;;  %v417_v33 = vmul.f32 0.5, %v401_v45  ;;  %v410_v13 = vadd.f32 %v907_v38, %v298_v3 }
  0xec   :  { %v415_v58 = vmul.f32 0.5, %v399_v51  ;;  %v418_v61 = vmul.f32 0.5, %v402_v55  ;;  %v408_v63 = vadd.f32 %v899_v34, %v296_v59  ;;  %v423_v0 = vmul.f32 0.5, %v407_v56 }
  0xed   :  { %v416_v60 = vmul.f32 0.5, %v400_v57  ;;  %v943_v35 = vpop.permute.xlu1 %500  ;;  %v397_v19 = vpop.permute.xlu0 %396  ;;  %v426_v20 = vmul.f32 0.5, %v410_v13 }
  0xee   :  { %695 = vtanh.f32 %v415_v58  ;;  %v424_v11 = vmul.f32 0.5, %v408_v63 }
  0xef   :  { %v293_v1 = vld [vmem:[#allocation2 + $0x30] sm:$0xff]  ;;  %697 = vtanh.f32 %v416_v60 }
  0xf0   :  { %v291_v30 = vld [vmem:[#allocation2 + $0x20] sm:$0xff]  ;;  %v405_v2 = vadd.f32 %v917_v47, %v293_v1  ;;  %699 = vtanh.f32 %v417_v33  ;;  %v301_v17 = vld [vmem:[#allocation2 + $0x70] sm:$0xff] }
  0xf1   :  { %v403_v4 = vadd.f32 %v913_v41, %v291_v30  ;;  %701 = vtanh.f32 %v418_v61  ;;  %v294_v6 = vld [vmem:[#allocation2 + $0x38] sm:$0xff]  ;;  %v299_v10 = vld [vmem:[#allocation2 + $0x60] sm:$0xff]  ;;  %v949_v18 = vpop.permute.xlu1 %504  ;;  %v413_v24 = vadd.f32 %v392_v29, %v301_v17 }
  0xf2   :  { %703 = vtanh.f32 %v425_v62  ;;  %v292_v8 = vld [vmem:[#allocation2 + $0x28] sm:$0xff]  ;;  %v421_v9 = vmul.f32 0.5, %v405_v2  ;;  %v406_v34 = vadd.f32 %v895_v32, %v294_v6  ;;  %v411_v16 = vadd.f32 %v382_v5, %v299_v10  ;;  %v302_v32 = vld [vmem:[#allocation2 + $0x78] sm:$0xff] }
  0xf3   :  { %705 = vtanh.f32 %v423_v0  ;;  %v404_v12 = vadd.f32 %v893_v31, %v292_v8  ;;  %v419_v47 = vmul.f32 0.5, %v403_v4  ;;  %v300_v15 = vld [vmem:[#allocation2 + $0x68] sm:$0xff]  ;;  %v414_v27 = vadd.f32 %v397_v19, %v302_v32  ;;  %v513_v8 = vpop.permute.xlu0 %512 }
  0xf4   :  { %707 = vtanh.f32 %v421_v9  ;;  %v422_v14 = vmul.f32 0.5, %v406_v34  ;;  %v412_v21 = vadd.f32 %v927_v7, %v300_v15  ;;  %v427_v23 = vmul.f32 0.5, %v411_v16 }
  0xf5   :  { %v420_v41 = vmul.f32 0.5, %v404_v12  ;;  %709 = vtanh.f32 %v419_v47  ;;  %v509_v52 = vpop.permute.xlu1 %508  ;;  %v429_v53 = vmul.f32 0.5, %v413_v24  ;;  %v430_v59 = vmul.f32 0.5, %v414_v27 }
  0xf6   :  { %711 = vtanh.f32 %v424_v11  ;;  %v428_v45 = vmul.f32 0.5, %v412_v21 }
  0xf7   :  { %713 = vtanh.f32 %v420_v41 }
  0xf8   :  { %v696_v31 = vpop.eup %695  ;;  %715 = vtanh.f32 %v422_v14 }
  0xf9   :  { %v698_v22 = vpop.eup %697  ;;  %v447_v38 = vmul.f32 0.5, %v696_v31  ;;  %717 = vtanh.f32 %v426_v20  ;;  %v517_v6 = vpop.permute.xlu1 %516 }
  0xfa   :  { %v700_v25 = vpop.eup %699  ;;  %v448_v26 = vmul.f32 0.5, %v698_v22  ;;  %719 = vtanh.f32 %v427_v23  ;;  %v525_v23 = vpop.permute.xlu0 %524 }
  0xfb   :  { %v702_v28 = vpop.eup %701  ;;  %v449_v42 = vmul.f32 0.5, %v700_v25  ;;  %v463_v43 = vadd.f32 0.5, %v447_v38  ;;  %721 = vtanh.f32 %v428_v45 }
  0xfc   :  { %v704_v46 = vpop.eup %703  ;;  %v450_v48 = vmul.f32 0.5, %v702_v28  ;;  %v464_v49 = vadd.f32 0.5, %v448_v26  ;;  %723 = vtanh.f32 %v429_v53 }
  0xfd   :  { %v706_v50 = vpop.eup %705  ;;  %v465_v51 = vadd.f32 0.5, %v449_v42  ;;  %v543_v7 = vmul.f32 %v903_v36, %v463_v43  ;;  %725 = vtanh.f32 %v430_v59  ;;  %v457_v13 = vmul.f32 0.5, %v704_v46  ;;  %v521_v38 = vpop.permute.xlu1 %520 }
  0xfe   :  { %v708_v54 = vpop.eup %707  ;;  %v466_v55 = vadd.f32 0.5, %v450_v48  ;;  %v544_v29 = vmul.f32 %v905_v37, %v464_v49  ;;  %v455_v1 = vmul.f32 0.5, %v706_v50 }
  0xff   :  { %v710_v56 = vpop.eup %709  ;;  %v453_v57 = vmul.f32 0.5, %v708_v54  ;;  %v545_v58 = vmul.f32 %v911_v40, %v465_v51  ;;  %v559_v62 = vsel %vm24_vm1, %v543_v7, 0.0  ;;  %v473_v25 = vadd.f32 0.5, %v457_v13  ;;  %v533_v54 = vpop.permute.xlu0 %532 }
 0x100   :  { %v712_v33 = vpop.eup %711  ;;  %v451_v60 = vmul.f32 0.5, %v710_v56  ;;  %v546_v61 = vmul.f32 %v915_v44, %v466_v55  ;;  %v560_v36 = vsel %vm24_vm1, %v544_v29, 0.0  ;;  %v471_v16 = vadd.f32 0.5, %v455_v1 }
 0x101   :  { %v714_v63 = vpop.eup %713  ;;  %v561_v0 = vadd.f32 %v560_v36, %v559_v62  ;;  %v469_v3 = vadd.f32 0.5, %v453_v57  ;;  %v562_v40 = vsel %vm24_vm1, %v545_v58, 0.0  ;;  %v456_v34 = vmul.f32 0.5, %v712_v33  ;;  %v529_v53 = vpop.permute.xlu1 %528 }
 0x102   :  { %v716_v30 = vpop.eup %715  ;;  %v452_v37 = vmul.f32 0.5, %v714_v63  ;;  %v467_v2 = vadd.f32 0.5, %v451_v60  ;;  %v564_v10 = vsel %vm24_vm1, %v546_v61, 0.0  ;;  %v553_v49 = vmul.f32 %v521_v38, %v473_v25 }
 0x103   :  { %v563_v4 = vadd.f32 %v562_v40, %v561_v0  ;;  %v454_v5 = vmul.f32 0.5, %v716_v30  ;;  %v718_v11 = vpop.eup %717  ;;  %v549_v15 = vmul.f32 %v949_v18, %v469_v3  ;;  %v541_v30 = vpop.permute.xlu0 %540  ;;  %v597_v13 = vstv %s993_s3 }
 0x104   :  { %v468_v44 = vadd.f32 0.5, %v452_v37  ;;  %v547_v9 = vmul.f32 %v909_v39, %v467_v2  ;;  %v720_v17 = vpop.eup %719  ;;  %v472_v39 = vadd.f32 0.5, %v456_v34  ;;  %v458_v21 = vmul.f32 0.5, %v718_v11 }
 0x105   :  { %v565_v12 = vadd.f32 %v564_v10, %v563_v4  ;;  %v470_v47 = vadd.f32 0.5, %v454_v5  ;;  %v722_v31 = vpop.eup %721  ;;  %v570_v24 = vsel %vm24_vm1, %v549_v15, 0.0  ;;  %v459_v26 = vmul.f32 0.5, %v720_v17  ;;  %v537_v1 = vpop.permute.xlu1 %536 }
 0x106   :  { %v548_v14 = vmul.f32 %v943_v35, %v468_v44  ;;  %v566_v41 = vsel %vm24_vm1, %v547_v9, 0.0  ;;  %v551_v35 = vmul.f32 %v513_v8, %v471_v16  ;;  %v724_v18 = vpop.eup %723  ;;  %v552_v42 = vmul.f32 %v517_v6, %v472_v39 }
 0x107   :  { %v567_v19 = vadd.f32 %v566_v41, %v565_v12  ;;  %v550_v20 = vmul.f32 %v509_v52, %v470_v47  ;;  %v474_v43 = vadd.f32 0.5, %v458_v21  ;;  %v460_v45 = vmul.f32 0.5, %v722_v31  ;;  %v726_v46 = vpop.eup %725 }
 0x108   :  { %v568_v32 = vsel %vm24_vm1, %v548_v14, 0.0  ;;  %v574_v50 = vsel %vm24_vm1, %v551_v35, 0.0  ;;  %v475_v51 = vadd.f32 0.5, %v459_v26  ;;  %v461_v7 = vmul.f32 0.5, %v724_v18 }
 0x109   :  { %v569_v22 = vadd.f32 %v568_v32, %v567_v19  ;;  %v572_v28 = vsel %vm24_vm1, %v550_v20, 0.0  ;;  %v576_v55 = vsel %vm24_vm1, %v552_v42, 0.0  ;;  %v554_v29 = vmul.f32 %v525_v23, %v474_v43 }
 0x10a   :  { %v476_v56 = vadd.f32 0.5, %v460_v45  ;;  %v462_v57 = vmul.f32 0.5, %v726_v46  ;;  %v578_v59 = vsel %vm24_vm1, %v553_v49, 0.0  ;;  %v555_v33 = vmul.f32 %v529_v53, %v475_v51 }
 0x10b   :  { %v571_v27 = vadd.f32 %v570_v24, %v569_v22  ;;  %v477_v60 = vadd.f32 0.5, %v461_v7  ;;  %v580_v62 = vsel %vm24_vm1, %v554_v29, 0.0 }
 0x10c   :  { %v556_v36 = vmul.f32 %v533_v54, %v476_v56  ;;  %v478_v63 = vadd.f32 0.5, %v462_v57  ;;  %v582_v37 = vsel %vm24_vm1, %v555_v33, 0.0 }
 0x10d   :  { %v573_v48 = vadd.f32 %v572_v28, %v571_v27  ;;  %v557_v2 = vmul.f32 %v537_v1, %v477_v60 }
 0x10e   :  { %v584_v40 = vsel %vm24_vm1, %v556_v36, 0.0  ;;  %v558_v4 = vmul.f32 %v541_v30, %v478_v63 }
 0x10f   :  { %v575_v52 = vadd.f32 %v574_v50, %v573_v48  ;;  %v586_v6 = vsel %vm24_vm1, %v557_v2, 0.0 }
 0x110   :  { %v588_v44 = vsel %vm24_vm1, %v558_v4, 0.0 }
 0x111   :  { %v577_v58 = vadd.f32 %v576_v55, %v575_v52 }
 0x113   :  { %v579_v61 = vadd.f32 %v578_v59, %v577_v58 }
 0x115   :  { %v581_v0 = vadd.f32 %v580_v62, %v579_v61 }
 0x117   :  { %v583_v3 = vadd.f32 %v582_v37, %v581_v0 }
 0x119   :  { %v585_v5 = vadd.f32 %v584_v40, %v583_v3 }
 0x11b   :  { %v587_v8 = vadd.f32 %v586_v6, %v585_v5 }
 0x11d   :  { %v589_v9 = vadd.f32 %v588_v44, %v587_v8 }
 0x11f   :  { %v590_v10 = vrot.slane %v589_v9, 4 }
 0x121   :  { %v591_v34 = vadd.f32 %v590_v10, %v589_v9 }
 0x123   :  { %v592_v11 = vrot.slane %v591_v34, 2 }
 0x125   :  { %v593_v12 = vadd.f32 %v592_v11, %v591_v34 }
 0x127   :  { %v594_v47 = vrot.slane %v593_v12, 1 }
 0x129   :  { %v595_v14 = vadd.f32 %v594_v47, %v593_v12 }
 0x12b   :  { %v598_v15 = vadd.f32 %v597_v13, %v595_v14 }
 0x12d   :  { %v599_v41 = vmul.f32 0.5, %v598_v15 }
 0x12f   :  { %727 = vtanh.f32 %v599_v41 }
 0x139   :  { %v728_v16 = vpop.eup %727 }
 0x13a   :  { %v601_v17 = vmul.f32 0.5, %v728_v16 }
 0x13c   :  { %v602_v19 = vadd.f32 0.5, %v601_v17 }
 0x13e   :  { %604 = vst.msk [vmem:[#allocation4] sm:$0x1] %vm603_vm2, %v602_v19 }
 0x13f   :  { %740 = shalt.err (!%p737_p4)
}
 0x140   :  { %s741_s18 = scalar_lea.hbm %s994_s4, 16 }
 0x141   :  { %p742_p5 = scmp.ne.s32.totalorder %s994_s4, %s741_s18  ;;  %p745_p6 = scmp.lt.u32.totalorder %s741_s18, %s994_s4 }
 0x143   :  { %p747_p7 = pnand %p745_p6, %p742_p5 }
 0x145   :  { %750 = shalt.err (!%p747_p7)
}
 0x146   :  { %614 = dma.vmem_to_hbm [thread:$0]  %s612_s14, 16, %s994_s4, [#allocation5]  }
 0x147   :  { %751 = dma.done.wait [#allocation5], 16  }
 0x148   :  { %752 = vsyncadd [#allocation5], 4294967280 }
 0x149   :  { %618 = vsyncpa [#allocation5], 1 }

</bundles_post_ra>
